<compile_context>
chip_gen: v6e
topology: v6e:2x2x1
jax: 0.10.0
libtpu: 0.0.40
codegen_flags: <defaults>
</compile_context>

<pallas_src>
import functools

import jax
import jax.numpy as jnp
from jax.experimental import pallas as pl
from jax.experimental.pallas import tpu as pltpu

BN_EPS = 1e-5


def _round_up(n, m):
    return ((n + m - 1) // m) * m


def _ffnn_kernel(x_ref, w1_ref, b1_ref, w2_ref, b2_ref, w3_ref, b3_ref, o_ref):
    cdt = w1_ref.dtype  # matmul compute dtype (bf16 or f32)

    # --- fc1 (+ folded BN1) + ReLU ---
    h = jnp.dot(x_ref[...], w1_ref[...], preferred_element_type=jnp.float32)
    h = jnp.maximum(h + b1_ref[...], 0.0)          # single add + max (f32)

    # --- fc2 (+ folded BN2) + ReLU ---
    h = jnp.dot(h.astype(cdt), w2_ref[...], preferred_element_type=jnp.float32)
    h = jnp.maximum(h + b2_ref[...], 0.0)

    # --- fc3 ---
    out = jnp.dot(h.astype(cdt), w3_ref[...], preferred_element_type=jnp.float32)
    o_ref[...] = (out + b3_ref[...]).astype(o_ref.dtype)


def prepare_params(params, compute_dtype=jnp.bfloat16):
    """One-time parameter preparation (call once, reuse across forward calls).

    Folds eval-mode BatchNorm into the preceding Linear layers, zero-pads all
    feature dims to 128-lane multiples (exact: padded hidden units get bias 0,
    ReLU(0)=0, and feed zero rows of w2/w3), and casts the matmul operands to
    `compute_dtype`. Biases stay f32 for the epilogue math.
    """
    input_dim, hidden_dim = params["w1"].shape
    output_dim = params["w3"].shape[1]
    Ip, Hp, Op = (_round_up(d, 128) for d in (input_dim, hidden_dim, output_dim))

    s1 = params["gamma1"] * jax.lax.rsqrt(params["var1"] + BN_EPS)      # (1, H)
    w1f = params["w1"] * s1                                              # (I, H)
    b1f = (params["b1"] - params["mean1"]) * s1 + params["beta1"]        # (1, H)

    s2 = params["gamma2"] * jax.lax.rsqrt(params["var2"] + BN_EPS)
    w2f = params["w2"] * s2
    b2f = (params["b2"] - params["mean2"]) * s2 + params["beta2"]

    def pad2(a, rows, cols):
        return jnp.pad(a, ((0, rows - a.shape[0]), (0, cols - a.shape[1])))

    prepared = dict(
        w1=pad2(w1f, Ip, Hp).astype(compute_dtype),
        b1=pad2(b1f, 1, Hp),
        w2=pad2(w2f, Hp, Hp).astype(compute_dtype),
        b2=pad2(b2f, 1, Hp),
        w3=pad2(params["w3"], Hp, Op).astype(compute_dtype),
        b3=pad2(params["b3"], 1, Op),
    )
    jax.block_until_ready(prepared)
    return prepared


@functools.partial(
    jax.jit, static_argnames=("output_dim", "block_batch", "unpad", "out_dtype")
)
def ffnn_forward(x, prepared, *, output_dim, block_batch=128, unpad=True,
                 out_dtype=jnp.float32):
    """x: (B, input_dim) float32. prepared: output of prepare_params (cached)."""
    B, input_dim = x.shape
    Ip, Hp = prepared["w1"].shape
    Op = prepared["w3"].shape[1]
    cdt = prepared["w1"].dtype

    # ---- batch tiling: aim for >=2 grid steps (v7x megacore) when batch allows ----
    Bp0 = _round_up(B, 8)
    tb = min(block_batch, _round_up(max(Bp0 // 2, 8), 16))
    Bp = _round_up(Bp0, tb)
    grid = (Bp // tb,)

    # ---- pad + cast activations only (weights were prepared once) ----
    xp = jnp.pad(x, ((0, Bp - B), (0, Ip - input_dim))).astype(cdt)

    # ---- VMEM budget (explicit, with headroom; capped under v7x's 64 MiB) ----
    cbytes = jnp.dtype(cdt).itemsize
    obytes = jnp.dtype(out_dtype).itemsize
    weight_bytes = (Ip * Hp + Hp * Hp + Hp * Op) * cbytes + (2 * Hp + Op) * 4
    io_bytes = 2 * tb * (Ip * cbytes + Op * obytes)      # double-buffered x / out tiles
    live_bytes = 3 * tb * Hp * 4                         # f32 intermediates headroom
    vmem_limit = int(
        min(56 * 2**20, max(32 * 2**20, 2 * (weight_bytes + io_bytes + live_bytes)))
    )

    cost = pl.CostEstimate(
        flops=2 * Bp * (Ip * Hp + Hp * Hp + Hp * Op),
        transcendentals=0,
        bytes_accessed=weight_bytes + Bp * Ip * cbytes + Bp * Op * obytes,
    )

    def resident(shape):
        # Grid-invariant operand: constant index_map, so single-buffer it
        # (no "next" block ever needs prefetching; halves its VMEM footprint).
        return pl.BlockSpec(shape, lambda i: (0, 0), pipeline_mode=pl.Buffered(1))

    in_specs = [
        pl.BlockSpec((tb, Ip), lambda i: (i, 0)),   # x (tiled over batch)
        resident((Ip, Hp)),                         # w1 (folded)
        resident((1, Hp)),                          # b1 (folded)
        resident((Hp, Hp)),                         # w2 (folded)
        resident((1, Hp)),                          # b2 (folded)
        resident((Hp, Op)),                         # w3
        resident((1, Op)),                          # b3
    ]
    out_spec = pl.BlockSpec((tb, Op), lambda i: (i, 0))   # lane-dense output

    out_padded = pl.pallas_call(
        _ffnn_kernel,
        out_shape=jax.ShapeDtypeStruct((Bp, Op), out_dtype),
        grid_spec=pltpu.PrefetchScalarGridSpec(
            num_scalar_prefetch=0,
            grid=grid,
            in_specs=in_specs,
            out_specs=out_spec,
        ),
        compiler_params=pltpu.CompilerParams(
            dimension_semantics=("parallel",),
            vmem_limit_bytes=vmem_limit,
        ),
        cost_estimate=cost,
    )(xp, prepared["w1"], prepared["b1"], prepared["w2"], prepared["b2"],
      prepared["w3"], prepared["b3"])

    if not unpad:
        # Perf path: skip the post-kernel narrow-column slice; consumer uses
        # out[:B, :output_dim] only when it actually needs the logical view.
        return out_padded
    return out_padded[:B, :output_dim]


def init_params(key, input_dim, hidden_dim, output_dim):
    """Deterministic synthetic parameters (PyTorch-like init, weights pre-transposed)."""
    ks = jax.random.split(key, 8)

    def linear(kw, kb, fan_in, fan_out):
        bound = 1.0 / jnp.sqrt(jnp.float32(fan_in))
        w = jax.random.uniform(kw, (fan_in, fan_out), jnp.float32, -bound, bound)
        b = jax.random.uniform(kb, (1, fan_out), jnp.float32, -bound, bound)
        return w, b

    w1, b1 = linear(ks[0], ks[1], input_dim, hidden_dim)
    w2, b2 = linear(ks[2], ks[3], hidden_dim, hidden_dim)
    w3, b3 = linear(ks[4], ks[5], hidden_dim, output_dim)

    # Non-trivial BN affine params + running stats so the BN math is exercised.
    gamma1 = 1.0 + 0.1 * jax.random.normal(ks[6], (1, hidden_dim), jnp.float32)
    beta1 = 0.1 * jax.random.normal(ks[7], (1, hidden_dim), jnp.float32)
    mean1 = 0.05 * jnp.arange(hidden_dim, dtype=jnp.float32).reshape(1, hidden_dim) / hidden_dim
    var1 = 1.0 + 0.2 * jnp.cos(jnp.arange(hidden_dim, dtype=jnp.float32)).reshape(1, hidden_dim) ** 2

    gamma2 = 1.0 - 0.05 * jnp.sin(jnp.arange(hidden_dim, dtype=jnp.float32)).reshape(1, hidden_dim)
    beta2 = 0.02 * jnp.arange(hidden_dim, dtype=jnp.float32).reshape(1, hidden_dim) / hidden_dim
    mean2 = -0.03 * jnp.ones((1, hidden_dim), jnp.float32)
    var2 = 0.9 * jnp.ones((1, hidden_dim), jnp.float32)

    return dict(
        w1=w1, b1=b1, gamma1=gamma1, beta1=beta1, mean1=mean1, var1=var1,
        w2=w2, b2=b2, gamma2=gamma2, beta2=beta2, mean2=mean2, var2=var2,
        w3=w3, b3=b3,
    )


def ffnn_reference(x, p):
    """Pure-JAX f32 reference (eval-mode PyTorch semantics, unfused)."""
    h = x @ p["w1"] + p["b1"]
    h = (h - p["mean1"]) / jnp.sqrt(p["var1"] + BN_EPS) * p["gamma1"] + p["beta1"]
    h = jnp.maximum(h, 0.0)
    h = h @ p["w2"] + p["b2"]
    h = (h - p["mean2"]) / jnp.sqrt(p["var2"] + BN_EPS) * p["gamma2"] + p["beta2"]
    h = jnp.maximum(h, 0.0)
    return h @ p["w3"] + p["b3"]


if __name__ == "__main__":
    # Small shapes consistent with the module: x is (batch, input_dim).
    B, INPUT_DIM, HIDDEN_DIM, OUTPUT_DIM = 16, 32, 64, 8

    key = jax.random.PRNGKey(0)
    kx, kp = jax.random.split(key)
    x = jax.random.normal(kx, (B, INPUT_DIM), jnp.float32)
    params = init_params(kp, INPUT_DIM, HIDDEN_DIM, OUTPUT_DIM)

    ref = ffnn_reference(x, params)

    # Exact-path check (f32 matmuls): tight tolerance.
    prep_f32 = prepare_params(params, compute_dtype=jnp.float32)
    out_f32 = jax.block_until_ready(ffnn_forward(x, prep_f32, output_dim=OUTPUT_DIM))
    assert out_f32.shape == (B, OUTPUT_DIM)
    assert jnp.allclose(out_f32, ref, atol=1e-4, rtol=1e-4), "f32 path mismatch vs reference"

    # Fast path (bf16 matmuls, f32 accumulation): params prepared ONCE and reused.
    prep_bf16 = prepare_params(params, compute_dtype=jnp.bfloat16)
    out_bf16 = jax.block_until_ready(ffnn_forward(x, prep_bf16, output_dim=OUTPUT_DIM))
    assert out_bf16.shape == (B, OUTPUT_DIM)
    assert jnp.allclose(out_bf16, ref, atol=3e-2, rtol=3e-2), "bf16 path mismatch vs reference"

    # Padded fast path: no post-kernel narrow-column slice.
    out_pad = jax.block_until_ready(
        ffnn_forward(x, prep_bf16, output_dim=OUTPUT_DIM, unpad=False)
    )
    assert out_pad.shape[0] % 8 == 0 and out_pad.shape[1] % 128 == 0
    assert jnp.allclose(out_pad[:B, :OUTPUT_DIM], ref, atol=3e-2, rtol=3e-2), \
        "padded-output path mismatch vs reference"

    print("KERNEL_OK")
</pallas_src>

<mosaic_0001>
module attributes {stable_mosaic.version = 11 : i64} {
  func.func @_ffnn_kernel(%arg0: i32, %arg1: memref<16x128xf32, #tpu.memory_space<vmem>>, %arg2: memref<128x128xf32, #tpu.memory_space<vmem>>, %arg3: memref<1x128xf32, #tpu.memory_space<vmem>>, %arg4: memref<128x128xf32, #tpu.memory_space<vmem>>, %arg5: memref<1x128xf32, #tpu.memory_space<vmem>>, %arg6: memref<128x128xf32, #tpu.memory_space<vmem>>, %arg7: memref<1x128xf32, #tpu.memory_space<vmem>>, %arg8: memref<16x128xf32, #tpu.memory_space<vmem>>) attributes {dimension_semantics = [#tpu.dimension_semantics<parallel>], iteration_bounds = array<i64: 1>, scalar_prefetch = 0 : i64, scratch_operands = 0 : i64, tpu.core_type = #tpu.core_type<tc>, window_params = [{transform_indices = @transform_0, window_bounds = array<i64: 16, 128>}, {pipeline_mode = #tpu.pipeline_mode<synchronous>, transform_indices = @transform_1, window_bounds = array<i64: 128, 128>}, {pipeline_mode = #tpu.pipeline_mode<synchronous>, transform_indices = @transform_2, window_bounds = array<i64: 1, 128>}, {pipeline_mode = #tpu.pipeline_mode<synchronous>, transform_indices = @transform_3, window_bounds = array<i64: 128, 128>}, {pipeline_mode = #tpu.pipeline_mode<synchronous>, transform_indices = @transform_4, window_bounds = array<i64: 1, 128>}, {pipeline_mode = #tpu.pipeline_mode<synchronous>, transform_indices = @transform_5, window_bounds = array<i64: 128, 128>}, {pipeline_mode = #tpu.pipeline_mode<synchronous>, transform_indices = @transform_6, window_bounds = array<i64: 1, 128>}, {transform_indices = @transform_7, window_bounds = array<i64: 16, 128>}]} {
    %c0 = arith.constant 0 : index
    %c0_0 = arith.constant 0 : index
    %0 = vector.load %arg1[%c0, %c0_0] : memref<16x128xf32, #tpu.memory_space<vmem>>, vector<16x128xf32>
    %c0_1 = arith.constant 0 : index
    %c0_2 = arith.constant 0 : index
    %1 = vector.load %arg2[%c0_1, %c0_2] : memref<128x128xf32, #tpu.memory_space<vmem>>, vector<128x128xf32>
    %cst = arith.constant dense<0.000000e+00> : vector<16x128xf32>
    %2 = tpu.matmul %0, %1, %cst {dimension_numbers = #tpu.dot_dimension_numbers<[1], [0], [0], [1], [0, 0, 1, 1], [], []>} : vector<16x128xf32>, vector<128x128xf32>, vector<16x128xf32> -> vector<16x128xf32>
    %c0_3 = arith.constant 0 : index
    %c0_4 = arith.constant 0 : index
    %3 = vector.load %arg3[%c0_3, %c0_4] : memref<1x128xf32, #tpu.memory_space<vmem>>, vector<1x128xf32>
    %4 = vector.broadcast %3 : vector<1x128xf32> to vector<16x128xf32>
    %5 = arith.addf %2, %4 : vector<16x128xf32>
    %cst_5 = arith.constant 0.000000e+00 : f32
    %6 = vector.broadcast %cst_5 : f32 to vector<16x128xf32>
    %7 = arith.maximumf %5, %6 : vector<16x128xf32>
    %c0_6 = arith.constant 0 : index
    %c0_7 = arith.constant 0 : index
    %8 = vector.load %arg4[%c0_6, %c0_7] : memref<128x128xf32, #tpu.memory_space<vmem>>, vector<128x128xf32>
    %cst_8 = arith.constant dense<0.000000e+00> : vector<16x128xf32>
    %9 = tpu.matmul %7, %8, %cst_8 {dimension_numbers = #tpu.dot_dimension_numbers<[1], [0], [0], [1], [0, 0, 1, 1], [], []>} : vector<16x128xf32>, vector<128x128xf32>, vector<16x128xf32> -> vector<16x128xf32>
    %c0_9 = arith.constant 0 : index
    %c0_10 = arith.constant 0 : index
    %10 = vector.load %arg5[%c0_9, %c0_10] : memref<1x128xf32, #tpu.memory_space<vmem>>, vector<1x128xf32>
    %11 = vector.broadcast %10 : vector<1x128xf32> to vector<16x128xf32>
    %12 = arith.addf %9, %11 : vector<16x128xf32>
    %cst_11 = arith.constant 0.000000e+00 : f32
    %13 = vector.broadcast %cst_11 : f32 to vector<16x128xf32>
    %14 = arith.maximumf %12, %13 : vector<16x128xf32>
    %c0_12 = arith.constant 0 : index
    %c0_13 = arith.constant 0 : index
    %15 = vector.load %arg6[%c0_12, %c0_13] : memref<128x128xf32, #tpu.memory_space<vmem>>, vector<128x128xf32>
    %cst_14 = arith.constant dense<0.000000e+00> : vector<16x128xf32>
    %16 = tpu.matmul %14, %15, %cst_14 {dimension_numbers = #tpu.dot_dimension_numbers<[1], [0], [0], [1], [0, 0, 1, 1], [], []>} : vector<16x128xf32>, vector<128x128xf32>, vector<16x128xf32> -> vector<16x128xf32>
    %c0_15 = arith.constant 0 : index
    %c0_16 = arith.constant 0 : index
    %17 = vector.load %arg7[%c0_15, %c0_16] : memref<1x128xf32, #tpu.memory_space<vmem>>, vector<1x128xf32>
    %18 = vector.broadcast %17 : vector<1x128xf32> to vector<16x128xf32>
    %19 = arith.addf %16, %18 : vector<16x128xf32>
    %c0_17 = arith.constant 0 : index
    %c0_18 = arith.constant 0 : index
    %20 = vector.load %arg8[%c0_17, %c0_18] : memref<16x128xf32, #tpu.memory_space<vmem>>, vector<16x128xf32>
    tpu.vector_store %arg8[%c0_17, %c0_18], %19 {strides = array<i32>} : memref<16x128xf32, #tpu.memory_space<vmem>>, vector<16x128xf32>,
    return
  }
  func.func @transform_0(%arg0: i32) -> (i32, i32) {
    %c0_i32 = arith.constant 0 : i32
    %c0_i32_0 = arith.constant 0 : i32
    return %arg0, %c0_i32 : i32, i32
  }
  func.func @transform_1(%arg0: i32) -> (i32, i32) {
    %c0_i32 = arith.constant 0 : i32
    %c0_i32_0 = arith.constant 0 : i32
    %c0_i32_1 = arith.constant 0 : i32
    return %c0_i32, %c0_i32_0 : i32, i32
  }
  func.func @transform_2(%arg0: i32) -> (i32, i32) {
    %c0_i32 = arith.constant 0 : i32
    %c0_i32_0 = arith.constant 0 : i32
    %c0_i32_1 = arith.constant 0 : i32
    return %c0_i32, %c0_i32_0 : i32, i32
  }
  func.func @transform_3(%arg0: i32) -> (i32, i32) {
    %c0_i32 = arith.constant 0 : i32
    %c0_i32_0 = arith.constant 0 : i32
    %c0_i32_1 = arith.constant 0 : i32
    return %c0_i32, %c0_i32_0 : i32, i32
  }
  func.func @transform_4(%arg0: i32) -> (i32, i32) {
    %c0_i32 = arith.constant 0 : i32
    %c0_i32_0 = arith.constant 0 : i32
    %c0_i32_1 = arith.constant 0 : i32
    return %c0_i32, %c0_i32_0 : i32, i32
  }
  func.func @transform_5(%arg0: i32) -> (i32, i32) {
    %c0_i32 = arith.constant 0 : i32
    %c0_i32_0 = arith.constant 0 : i32
    %c0_i32_1 = arith.constant 0 : i32
    return %c0_i32, %c0_i32_0 : i32, i32
  }
  func.func @transform_6(%arg0: i32) -> (i32, i32) {
    %c0_i32 = arith.constant 0 : i32
    %c0_i32_0 = arith.constant 0 : i32
    %c0_i32_1 = arith.constant 0 : i32
    return %c0_i32, %c0_i32_0 : i32, i32
  }
  func.func @transform_7(%arg0: i32) -> (i32, i32) {
    %c0_i32 = arith.constant 0 : i32
    %c0_i32_0 = arith.constant 0 : i32
    return %arg0, %c0_i32 : i32, i32
  }
}

</mosaic_0001>

<bundles_post_ra>
// kernel: ffnn_forward.1
= control target key start
LH: loop header
LB: loop body
LE: loop exit
PB: predicated region body
PF: predicated region fallthrough
CT: control target
= control target key end

     0   :  { %12 = vsyncpa [#allocation3], 0  ;;  %s681_s0 = inlined_call_operand.vmem [shape: f32[16,128], index: 0, kind: input, shape index: {}]   ;;  %s682_s1 = inlined_call_operand.hbm [shape: f32[128,128], index: 1, kind: input, shape index: {}]   ;;  %s683_s2 = inlined_call_operand.vmem [shape: f32[1,128], index: 2, kind: input, shape index: {}]   ;;  %s684_s3 = inlined_call_operand.hbm [shape: f32[128,128], index: 3, kind: input, shape index: {}]   ;;  %s685_s4 = inlined_call_operand.vmem [shape: f32[1,128], index: 4, kind: input, shape index: {}]   ;;  %s686_s5 = inlined_call_operand.hbm [shape: f32[128,128], index: 5, kind: input, shape index: {}]   ;;  %s687_s6 = inlined_call_operand.vmem [shape: f32[1,128], index: 6, kind: input, shape index: {}]   ;;  %s688_s7 = inlined_call_operand.vmem [shape: f32[16,128], index: 7, kind: output, shape index: {}]  }
   0x1   :  { %13 = vsyncpa [#allocation5], 0  ;;  %s606_s24 = smov [#allocation4]   ;;  %s607_s26 = smov [#allocation2]  }
   0x2   :  { %s35_s25 = sshll.u32 %s606_s24, 4  ;;  %s21_s27 = sshll.u32 %s607_s26, 4  ;;  %s36_s25 = int_to_ptr.vmem [resolvable:$true] %s35_s25  ;;  %s22_s27 = int_to_ptr.vmem [resolvable:$true] %s21_s27 }
   0x3   :  { %s550_s28 = scalar_lea.vmem %s36_s25, 2048  ;;  %p555_p1 = scmp.lt.s32.totalorder %s36_s25, %s36_s25 }
   0x4   :  { %p551_p0 = scmp.ne.s32.totalorder %s36_s25, %s550_s28  ;;  %p556_p2 = scmp.lt.s32.totalorder %s550_s28, %s550_s28 }
   0x6   :  { %p557_p3 = por %p556_p2, %p555_p1 }
   0x8   :  { %p558_p4 = pnand %p557_p3, %p551_p0 }
   0xa   :  { %561 = shalt.err (!%p558_p4)
}
   0xb   :  { %s608_s29 = smov 128   ;;  %s609_s30 = smov 8  }
   0xc   :  { %41 = dma.hbm_to_vmem [thread:$0]  %s684_s3, 2048, %s36_s25, [#allocation5], %s608_s29, %s608_s29, %s609_s30  }
   0xd   :  { %s570_s10 = scalar_lea.vmem %s22_s27, 2048  ;;  %p575_p6 = scmp.lt.s32.totalorder %s22_s27, %s22_s27 }
   0xe   :  { %p571_p5 = scmp.ne.s32.totalorder %s22_s27, %s570_s10  ;;  %p576_p7 = scmp.lt.s32.totalorder %s570_s10, %s570_s10 }
  0x10   :  { %p577_p8 = por %p576_p7, %p575_p6 }
  0x12   :  { %p578_p9 = pnand %p577_p8, %p571_p5 }
  0x14   :  { %581 = shalt.err (!%p578_p9)
}
  0x15   :  { %27 = dma.hbm_to_vmem [thread:$0]  %s682_s1, 2048, %s22_s27, [#allocation3], %s608_s29, %s608_s29, %s609_s30  }
  0x16   :  { %s610_s13 = smov [#allocation6]  }
  0x17   :  { %s49_s14 = sshll.u32 %s610_s13, 4  ;;  %s50_s14 = int_to_ptr.vmem [resolvable:$true] %s49_s14 }
  0x18   :  { %s590_s15 = scalar_lea.vmem %s50_s14, 2048  ;;  %p595_p11 = scmp.lt.s32.totalorder %s50_s14, %s50_s14 }
  0x19   :  { %p591_p10 = scmp.ne.s32.totalorder %s50_s14, %s590_s15  ;;  %p596_p12 = scmp.lt.s32.totalorder %s590_s15, %s590_s15 }
  0x1b   :  { %p597_p13 = por %p596_p12, %p595_p11 }
  0x1d   :  { %p598_p0 = pnand %p597_p13, %p591_p10 }
  0x1f   :  { %601 = shalt.err (!%p598_p0)
}
  0x20   :  { %55 = dma.hbm_to_vmem [thread:$0]  %s686_s5, 2048, %s50_s14, [#allocation5], %s608_s29, %s608_s29, %s609_s30  }
  0x21   :  { %602 = dma.done.wait [#allocation3], 2048  }
  0x22   :  { %603 = vsyncadd [#allocation3], 4294965248 }
  0x23   :  { %604 = dma.done.wait [#allocation5], 4096  }
  0x24   :  { %605 = vsyncadd [#allocation5], 4294963200  ;;  %v84_v0 = vld [vmem:[#allocation2 + $0x78] sm:$0xff]  ;;  %v83_v1 = vld [vmem:[#allocation2 + $0x70] sm:$0xff] }
  0x25   :  { %432 = vmatprep.subr.mxu0 %v84_v0  ;;  %v82_v2 = vld [vmem:[#allocation2 + $0x68] sm:$0xff]  ;;  %v81_v3 = vld [vmem:[#allocation2 + $0x60] sm:$0xff]  ;;  %v80_v5 = vld [vmem:[#allocation2 + $0x58] sm:$0xff] }
  0x26   :  { %433 = vmatpush3.msra.mxu0 %v84_v0  ;;  %v67_v4 = vld [vmem:[%s681_s0] sm:$0xff]  ;;  %v184_v6 = vld [vmem:[#allocation4 + $0x78] sm:$0xff]  ;;  %v183_v7 = vld [vmem:[#allocation4 + $0x70] sm:$0xff] }
  0x27   :  { %434 = vmatprep.subr.mxu0 %v83_v1  ;;  %464 = vmatprep.mubr.f32.mxu0 %v67_v4  ;;  %v79_v8 = vld [vmem:[#allocation2 + $0x50] sm:$0xff]  ;;  %v182_v9 = vld [vmem:[#allocation4 + $0x68] sm:$0xff]  ;;  %v181_v11 = vld [vmem:[#allocation4 + $0x60] sm:$0xff] }
  0x28   :  { %435 = vmatpush3.msra.mxu0 %v83_v1  ;;  %467 = vmatprep.subr.mxu1 %v184_v6  ;;  %v78_v10 = vld [vmem:[#allocation2 + $0x48] sm:$0xff]  ;;  %v77_v12 = vld [vmem:[#allocation2 + $0x40] sm:$0xff]  ;;  %v180_v13 = vld [vmem:[#allocation4 + $0x58] sm:$0xff] }
  0x29   :  { %436 = vmatprep.subr.mxu0 %v82_v2  ;;  %468 = vmatpush3.msra.mxu1 %v184_v6  ;;  %v76_v14 = vld [vmem:[#allocation2 + $0x38] sm:$0xff]  ;;  %v179_v15 = vld [vmem:[#allocation4 + $0x50] sm:$0xff]  ;;  %v178_v17 = vld [vmem:[#allocation4 + $0x48] sm:$0xff] }
  0x2a   :  { %437 = vmatpush3.msra.mxu0 %v82_v2  ;;  %469 = vmatprep.subr.mxu1 %v183_v7  ;;  %v75_v16 = vld [vmem:[#allocation2 + $0x30] sm:$0xff]  ;;  %v74_v18 = vld [vmem:[#allocation2 + $0x28] sm:$0xff]  ;;  %v177_v19 = vld [vmem:[#allocation4 + $0x40] sm:$0xff] }
  0x2b   :  { %438 = vmatprep.subr.mxu0 %v81_v3  ;;  %470 = vmatpush3.msra.mxu1 %v183_v7  ;;  %v73_v20 = vld [vmem:[#allocation2 + $0x20] sm:$0xff]  ;;  %v176_v21 = vld [vmem:[#allocation4 + $0x38] sm:$0xff]  ;;  %v175_v23 = vld [vmem:[#allocation4 + $0x30] sm:$0xff] }
  0x2c   :  { %439 = vmatpush3.msra.mxu0 %v81_v3  ;;  %471 = vmatprep.subr.mxu1 %v182_v9  ;;  %v72_v22 = vld [vmem:[#allocation2 + $0x18] sm:$0xff]  ;;  %v71_v24 = vld [vmem:[#allocation2 + $0x10] sm:$0xff]  ;;  %v174_v25 = vld [vmem:[#allocation4 + $0x28] sm:$0xff] }
  0x2d   :  { %440 = vmatprep.subr.mxu0 %v80_v5  ;;  %472 = vmatpush3.msra.mxu1 %v182_v9  ;;  %v70_v26 = vld [vmem:[#allocation2 + $0x8] sm:$0xff]  ;;  %v173_v27 = vld [vmem:[#allocation4 + $0x20] sm:$0xff]  ;;  %v172_v30 = vld [vmem:[#allocation4 + $0x18] sm:$0xff] }
  0x2e   :  { %441 = vmatpush3.msra.mxu0 %v80_v5  ;;  %473 = vmatprep.subr.mxu1 %v181_v11  ;;  %v69_v28 = vld [vmem:[#allocation2] sm:$0xff]  ;;  %v68_v29 = vld [vmem:[%s681_s0 + $0x8] sm:$0xff]  ;;  %v171_v31 = vld [vmem:[#allocation4 + $0x10] sm:$0xff] }
  0x2f   :  { %442 = vmatprep.subr.mxu0 %v79_v8  ;;  %474 = vmatpush3.msra.mxu1 %v181_v11  ;;  %v170_v32 = vld [vmem:[#allocation4 + $0x8] sm:$0xff]  ;;  %v169_v33 = vld [vmem:[#allocation4] sm:$0xff]  ;;  %v284_v34 = vld [vmem:[#allocation6 + $0x78] sm:$0xff] }
  0x30   :  { %443 = vmatpush3.msra.mxu0 %v79_v8  ;;  %475 = vmatprep.subr.mxu1 %v180_v13  ;;  %v283_v35 = vld [vmem:[#allocation6 + $0x70] sm:$0xff]  ;;  %v282_v36 = vld [vmem:[#allocation6 + $0x68] sm:$0xff]  ;;  %v281_v37 = vld [vmem:[#allocation6 + $0x60] sm:$0xff] }
  0x31   :  { %444 = vmatprep.subr.mxu0 %v78_v10  ;;  %476 = vmatpush3.msra.mxu1 %v180_v13  ;;  %v280_v38 = vld [vmem:[#allocation6 + $0x58] sm:$0xff]  ;;  %v279_v39 = vld [vmem:[#allocation6 + $0x50] sm:$0xff]  ;;  %v278_v40 = vld [vmem:[#allocation6 + $0x48] sm:$0xff] }
  0x32   :  { %445 = vmatpush3.msra.mxu0 %v78_v10  ;;  %477 = vmatprep.subr.mxu1 %v179_v15  ;;  %v277_v41 = vld [vmem:[#allocation6 + $0x40] sm:$0xff]  ;;  %v276_v42 = vld [vmem:[#allocation6 + $0x38] sm:$0xff]  ;;  %v275_v43 = vld [vmem:[#allocation6 + $0x30] sm:$0xff] }
  0x33   :  { %446 = vmatprep.subr.mxu0 %v77_v12  ;;  %478 = vmatpush3.msra.mxu1 %v179_v15  ;;  %v274_v44 = vld [vmem:[#allocation6 + $0x28] sm:$0xff]  ;;  %v273_v45 = vld [vmem:[#allocation6 + $0x20] sm:$0xff]  ;;  %v272_v53 = vld [vmem:[#allocation6 + $0x18] sm:$0xff] }
  0x34   :  { %447 = vmatpush3.msra.mxu0 %v77_v12  ;;  %479 = vmatprep.subr.mxu1 %v178_v17  ;;  %v375_v46 = vld [vmem:[%s683_s2] ss:$0 sm:$0xff]  ;;  %v271_v54 = vld [vmem:[#allocation6 + $0x10] sm:$0xff]  ;;  %v270_v55 = vld [vmem:[#allocation6 + $0x8] sm:$0xff] }
  0x35   :  { %448 = vmatprep.subr.mxu0 %v76_v14  ;;  %480 = vmatpush3.msra.mxu1 %v178_v17  ;;  %v269_v56 = vld [vmem:[#allocation6] sm:$0xff] }
  0x36   :  { %449 = vmatpush3.msra.mxu0 %v76_v14  ;;  %481 = vmatprep.subr.mxu1 %v177_v19  ;;  %v376_v57 = vld [vmem:[%s685_s4] ss:$0 sm:$0xff] }
  0x37   :  { %450 = vmatprep.subr.mxu0 %v75_v16  ;;  %482 = vmatpush3.msra.mxu1 %v177_v19  ;;  %v377_v0 = vld [vmem:[%s687_s6] ss:$0 sm:$0xff] }
  0x38   :  { %451 = vmatpush3.msra.mxu0 %v75_v16  ;;  %483 = vmatprep.subr.mxu1 %v176_v21 }
  0x39   :  { %452 = vmatprep.subr.mxu0 %v74_v18  ;;  %484 = vmatpush3.msra.mxu1 %v176_v21 }
  0x3a   :  { %453 = vmatpush3.msra.mxu0 %v74_v18  ;;  %485 = vmatprep.subr.mxu1 %v175_v23 }
  0x3b   :  { %454 = vmatprep.subr.mxu0 %v73_v20  ;;  %486 = vmatpush3.msra.mxu1 %v175_v23 }
  0x3c   :  { %455 = vmatpush3.msra.mxu0 %v73_v20  ;;  %487 = vmatprep.subr.mxu1 %v174_v25 }
  0x3d   :  { %456 = vmatprep.subr.mxu0 %v72_v22  ;;  %488 = vmatpush3.msra.mxu1 %v174_v25 }
  0x3e   :  { %457 = vmatpush3.msra.mxu0 %v72_v22  ;;  %489 = vmatprep.subr.mxu1 %v173_v27 }
  0x3f   :  { %458 = vmatprep.subr.mxu0 %v71_v24  ;;  %490 = vmatpush3.msra.mxu1 %v173_v27 }
  0x40   :  { %459 = vmatpush3.msra.mxu0 %v71_v24  ;;  %491 = vmatprep.subr.mxu1 %v172_v30 }
  0x41   :  { %460 = vmatprep.subr.mxu0 %v70_v26  ;;  %492 = vmatpush3.msra.mxu1 %v172_v30 }
  0x42   :  { %461 = vmatpush3.msra.mxu0 %v70_v26  ;;  %493 = vmatprep.subr.mxu1 %v171_v31 }
  0x43   :  { %462 = vmatprep.subr.mxu0 %v69_v28  ;;  %494 = vmatpush3.msra.mxu1 %v171_v31 }
  0x44   :  { %463 = vmatpush3.msra.mxu0 %v69_v28  ;;  %495 = vmatprep.subr.mxu1 %v170_v32 }
  0x45   :  { %465 = vmatmul.mubr.f32.vlgmr.msra.gmra.mxu0 %v68_v29  ;;  %496 = vmatpush3.msra.mxu1 %v170_v32 }
  0x46   :  { %497 = vmatprep.subr.mxu1 %v169_v33  ;;  %502 = vmatprep.subr.mxu0 %v284_v34 }
  0x47   :  { %498 = vmatpush3.msra.mxu1 %v169_v33  ;;  %503 = vmatpush3.msra.mxu0 %v284_v34 }
  0x48   :  { %504 = vmatprep.subr.mxu0 %v283_v35 }
  0x49   :  { %505 = vmatpush3.msra.mxu0 %v283_v35 }
  0x4a   :  { %506 = vmatprep.subr.mxu0 %v282_v36 }
  0x4b   :  { %507 = vmatpush3.msra.mxu0 %v282_v36 }
  0x4c   :  { %508 = vmatprep.subr.mxu0 %v281_v37 }
  0x4d   :  { %509 = vmatpush3.msra.mxu0 %v281_v37 }
  0x4e   :  { %510 = vmatprep.subr.mxu0 %v280_v38 }
  0x4f   :  { %511 = vmatpush3.msra.mxu0 %v280_v38 }
  0x50   :  { %512 = vmatprep.subr.mxu0 %v279_v39 }
  0x51   :  { %513 = vmatpush3.msra.mxu0 %v279_v39 }
  0x52   :  { %514 = vmatprep.subr.mxu0 %v278_v40 }
  0x53   :  { %515 = vmatpush3.msra.mxu0 %v278_v40 }
  0x54   :  { %516 = vmatprep.subr.mxu0 %v277_v41 }
  0x55   :  { %517 = vmatpush3.msra.mxu0 %v277_v41 }
  0x56   :  { %518 = vmatprep.subr.mxu0 %v276_v42 }
  0x57   :  { %519 = vmatpush3.msra.mxu0 %v276_v42 }
  0x58   :  { %520 = vmatprep.subr.mxu0 %v275_v43 }
  0x59   :  { %521 = vmatpush3.msra.mxu0 %v275_v43 }
  0x5a   :  { %522 = vmatprep.subr.mxu0 %v274_v44 }
  0x5b   :  { %523 = vmatpush3.msra.mxu0 %v274_v44 }
  0x5c   :  { %524 = vmatprep.subr.mxu0 %v273_v45 }
  0x5d   :  { %525 = vmatpush3.msra.mxu0 %v273_v45 }
  0x5e   :  { %526 = vmatprep.subr.mxu0 %v272_v53 }
  0x5f   :  { %527 = vmatpush3.msra.mxu0 %v272_v53 }
  0x60   :  { %528 = vmatprep.subr.mxu0 %v271_v54 }
  0x61   :  { %529 = vmatpush3.msra.mxu0 %v271_v54 }
  0x62   :  { %530 = vmatprep.subr.mxu0 %v270_v55 }
  0x63   :  { %531 = vmatpush3.msra.mxu0 %v270_v55 }
  0x64   :  { %532 = vmatprep.subr.mxu0 %v269_v56 }
  0x65   :  { %533 = vmatpush3.msra.mxu0 %v269_v56 }
 0x105   :  { %v466_v47 = vpop.f32.mrf.mxu0 }
 0x106   :  { %v164_v48 = vadd.f32 %v466_v47, %v375_v46 }
 0x107   :  { %v158_v49 = vpop.f32.mrf.mxu0 }
 0x108   :  { %v159_v50 = vadd.f32 %v375_v46, %v158_v49  ;;  %v168_v52 = vmax.f32 %v164_v48, 0.0 }
 0x10a   :  { %v167_v51 = vmax.f32 %v159_v50, 0.0 }
 0x10c   :  { %499 = vmatprep.mubr.f32.mxu1 %v167_v51 }
 0x10d   :  { %500 = vmatmul.mubr.f32.vlgmr.msra.gmra.mxu1 %v168_v52 }
 0x1cd   :  { %v501_v58 = vpop.f32.mrf.mxu1 }
 0x1ce   :  { %v264_v59 = vadd.f32 %v501_v58, %v376_v57 }
 0x1cf   :  { %v258_v60 = vpop.f32.mrf.mxu1 }
 0x1d0   :  { %v259_v61 = vadd.f32 %v376_v57, %v258_v60  ;;  %v268_v63 = vmax.f32 %v264_v59, 0.0 }
 0x1d2   :  { %v267_v62 = vmax.f32 %v259_v61, 0.0 }
 0x1d4   :  { %534 = vmatprep.mubr.f32.mxu0 %v267_v62 }
 0x1d5   :  { %535 = vmatmul.mubr.f32.vlgmr.msra.gmra.mxu0 %v268_v63 }
 0x295   :  { %v536_v1 = vpop.f32.mrf.mxu0 }
 0x296   :  { %v364_v2 = vadd.f32 %v536_v1, %v377_v0 }
 0x297   :  { %v358_v3 = vpop.f32.mrf.mxu0 }
 0x298   :  { %368 = vst [vmem:[%s688_s7 + $0x8] sm:$0xff] %v364_v2  ;;  %v359_v4 = vadd.f32 %v377_v0, %v358_v3 }
 0x29a   :  { %367 = vst [vmem:[%s688_s7] sm:$0xff] %v359_v4 }
 0x29b   :  { %373 = vsyncpa [#allocation3], 1 }
 0x29c   :  { %374 = vsyncpa [#allocation5], 1 }

</bundles_post_ra>
